<compile_context>
chip_gen: v5e
topology: v5e:2x2
jax: 0.10.0
libtpu: 0.0.40
codegen_flags: <defaults>
</compile_context>

<pallas_src>
import math
import jax
import jax.numpy as jnp
from jax.experimental import pallas as pl
from jax.experimental.pallas import tpu as pltpu


def _round_up(x, m):
    return ((x + m - 1) // m) * m


def _support_kernel(x_ref, w_ref, o_ref):
    # support tile = X_tile @ W   (MXU, f32 accumulate, stored bf16)
    o_ref[...] = jnp.dot(
        x_ref[...], w_ref[...], preferred_element_type=jnp.float32
    ).astype(o_ref.dtype)


def _aggregate_kernel(adj_ref, s_ref, b_ref, o_ref, acc_ref):
    # out row-tile i = sum_k adj[i, k] @ support[k]  + bias
    k = pl.program_id(1)

    @pl.when(k == 0)
    def _():
        acc_ref[...] = jnp.zeros_like(acc_ref)

    acc_ref[...] += jnp.dot(
        adj_ref[...], s_ref[...], preferred_element_type=jnp.float32
    )

    @pl.when(k == pl.num_programs(1) - 1)
    def _():
        o_ref[...] = (acc_ref[...] + b_ref[...]).astype(o_ref.dtype)


def graph_convolution(x, adj, weight, bias, *, tile=512):
    """GCN layer forward: adj @ (x @ weight) + bias.

    Two Pallas calls:
      1. row-tiled support = X @ W
      2. (row, k)-tiled adj @ support with a VMEM f32 accumulator + fused bias
    Inputs are cast to bf16 for the MXU; accumulation and output are f32.
    """
    N, F_in = x.shape
    F_out = weight.shape[1]

    fo_p = _round_up(F_out, 128)                 # lane-dense output width
    T = min(tile, _round_up(N, 128))             # square tile over N
    Np = _round_up(N, T)

    # --- zero-padded, bf16 operands (padding contributes exactly 0) -------
    x_p = jnp.zeros((Np, F_in), jnp.bfloat16).at[:N, :].set(
        x.astype(jnp.bfloat16))
    adj_p = jnp.zeros((Np, Np), jnp.bfloat16).at[:N, :N].set(
        adj.astype(jnp.bfloat16))
    w_p = jnp.zeros((F_in, fo_p), jnp.bfloat16).at[:, :F_out].set(
        weight.astype(jnp.bfloat16))
    b_p = jnp.zeros((1, fo_p), jnp.float32).at[0, :F_out].set(
        bias.astype(jnp.float32))

    vmem_limit = 32 * 1024 * 1024  # >= default everywhere; safe on 64 MiB v7x

    # --- phase 1: support = X @ W  (row-tiled, no reduction tiling needed) -
    support = pl.pallas_call(
        _support_kernel,
        out_shape=jax.ShapeDtypeStruct((Np, fo_p), jnp.bfloat16),
        grid_spec=pltpu.PrefetchScalarGridSpec(
            num_scalar_prefetch=0,
            grid=(Np // T,),
            in_specs=[
                pl.BlockSpec((T, F_in), lambda i: (i, 0)),
                pl.BlockSpec((F_in, fo_p), lambda i: (0, 0)),
            ],
            out_specs=pl.BlockSpec((T, fo_p), lambda i: (i, 0)),
        ),
        compiler_params=pltpu.CompilerParams(
            dimension_semantics=("parallel",),
            vmem_limit_bytes=vmem_limit,
        ),
        cost_estimate=pl.CostEstimate(
            flops=2 * Np * F_in * fo_p,
            transcendentals=0,
            bytes_accessed=2 * (Np * F_in + F_in * fo_p + Np * fo_p),
        ),
    )(x_p, w_p)

    # --- phase 2: out = adj @ support + bias  (row x reduction grid) -------
    out_p = pl.pallas_call(
        _aggregate_kernel,
        out_shape=jax.ShapeDtypeStruct((Np, fo_p), jnp.float32),
        grid_spec=pltpu.PrefetchScalarGridSpec(
            num_scalar_prefetch=0,
            grid=(Np // T, Np // T),
            in_specs=[
                pl.BlockSpec((T, T), lambda i, k: (i, k)),       # adj tile
                pl.BlockSpec((T, fo_p), lambda i, k: (k, 0)),    # support tile
                pl.BlockSpec((1, fo_p), lambda i, k: (0, 0)),    # bias
            ],
            out_specs=pl.BlockSpec((T, fo_p), lambda i, k: (i, 0)),
            scratch_shapes=[pltpu.VMEM((T, fo_p), jnp.float32)],
        ),
        compiler_params=pltpu.CompilerParams(
            dimension_semantics=("parallel", "arbitrary"),
            vmem_limit_bytes=vmem_limit,
        ),
        cost_estimate=pl.CostEstimate(
            flops=2 * Np * Np * fo_p,
            transcendentals=0,
            bytes_accessed=2 * Np * Np + 2 * Np * fo_p + 4 * Np * fo_p + 4 * fo_p,
        ),
    )(adj_p, support, b_p)

    # strip padding
    return out_p[:N, :F_out]


def init_params(key, in_features, out_features):
    """Matches reset_parameters(): uniform(-stdv, stdv), stdv = 1/sqrt(F_out)."""
    stdv = 1.0 / math.sqrt(out_features)
    kw, kb = jax.random.split(key)
    weight = jax.random.uniform(
        kw, (in_features, out_features), jnp.float32, minval=-stdv, maxval=stdv)
    bias = jax.random.uniform(
        kb, (out_features,), jnp.float32, minval=-stdv, maxval=stdv)
    return weight, bias


if __name__ == "__main__":
    key = jax.random.PRNGKey(0)
    k_x, k_adj, k_p = jax.random.split(key, 3)

    N = 200       # graph nodes (pads to 256; exercises multi-tile reduction)
    F_in = 48     # in_features
    F_out = 16    # out_features (padded to 128 lanes inside the wrapper)

    x = jax.random.normal(k_x, (N, F_in), jnp.float32)

    # Symmetric, row-normalized dense adjacency (spmm handled dense on TPU).
    a = (jax.random.uniform(k_adj, (N, N)) < 0.1).astype(jnp.float32)
    adj = a + a.T + jnp.eye(N, dtype=jnp.float32)
    adj = adj / jnp.sum(adj, axis=1, keepdims=True)

    weight, bias = init_params(k_p, F_in, F_out)

    # tile=128 -> Np=256, aggregate grid (2, 2): multi-k accumulation + padding
    # paths are exercised even at this small size.
    out = graph_convolution(x, adj, weight, bias, tile=128)
    out = jax.block_until_ready(out)

    # Reference in f32 (kernel uses bf16 inputs with f32 accumulation).
    ref = adj @ (x @ weight) + bias
    assert out.shape == (N, F_out)
    max_err = jnp.max(jnp.abs(out - ref))
    assert jnp.allclose(out, ref, atol=5e-2, rtol=5e-2), f"max err {max_err}"

    print("KERNEL_OK")
</pallas_src>

<mosaic_0001>
module attributes {stable_mosaic.version = 11 : i64} {
  func.func @_support_kernel(%arg0: i32, %arg1: memref<128x48xbf16, #tpu.memory_space<vmem>>, %arg2: memref<48x128xbf16, #tpu.memory_space<vmem>>, %arg3: memref<128x128xbf16, #tpu.memory_space<vmem>>) attributes {dimension_semantics = [#tpu.dimension_semantics<parallel>], iteration_bounds = array<i64: 2>, scalar_prefetch = 0 : i64, scratch_operands = 0 : i64, tpu.core_type = #tpu.core_type<tc>, window_params = [{transform_indices = @transform_0, window_bounds = array<i64: 128, 48>}, {pipeline_mode = #tpu.pipeline_mode<synchronous>, transform_indices = @transform_1, window_bounds = array<i64: 48, 128>}, {transform_indices = @transform_2, window_bounds = array<i64: 128, 128>}]} {
    %c0 = arith.constant 0 : index
    %c0_0 = arith.constant 0 : index
    %0 = vector.load %arg1[%c0, %c0_0] : memref<128x48xbf16, #tpu.memory_space<vmem>>, vector<128x48xbf16>
    %c0_1 = arith.constant 0 : index
    %c0_2 = arith.constant 0 : index
    %1 = vector.load %arg2[%c0_1, %c0_2] : memref<48x128xbf16, #tpu.memory_space<vmem>>, vector<48x128xbf16>
    %cst = arith.constant dense<0.000000e+00> : vector<128x128xf32>
    %2 = tpu.matmul %0, %1, %cst {dimension_numbers = #tpu.dot_dimension_numbers<[1], [0], [0], [1], [0, 0, 1, 1], [], []>} : vector<128x48xbf16>, vector<48x128xbf16>, vector<128x128xf32> -> vector<128x128xf32>
    %3 = arith.truncf %2 : vector<128x128xf32> to vector<128x128xbf16>
    %c0_3 = arith.constant 0 : index
    %c0_4 = arith.constant 0 : index
    %4 = vector.load %arg3[%c0_3, %c0_4] : memref<128x128xbf16, #tpu.memory_space<vmem>>, vector<128x128xbf16>
    tpu.vector_store %arg3[%c0_3, %c0_4], %3 {strides = array<i32>} : memref<128x128xbf16, #tpu.memory_space<vmem>>, vector<128x128xbf16>,
    return
  }
  func.func @transform_0(%arg0: i32) -> (i32, i32) {
    %c0_i32 = arith.constant 0 : i32
    %c0_i32_0 = arith.constant 0 : i32
    return %arg0, %c0_i32 : i32, i32
  }
  func.func @transform_1(%arg0: i32) -> (i32, i32) {
    %c0_i32 = arith.constant 0 : i32
    %c0_i32_0 = arith.constant 0 : i32
    %c0_i32_1 = arith.constant 0 : i32
    return %c0_i32, %c0_i32_0 : i32, i32
  }
  func.func @transform_2(%arg0: i32) -> (i32, i32) {
    %c0_i32 = arith.constant 0 : i32
    %c0_i32_0 = arith.constant 0 : i32
    return %arg0, %c0_i32 : i32, i32
  }
}

</mosaic_0001>

<bundles_post_ra>
// kernel: tpu_custom_call.1
= control target key start
LH: loop header
LB: loop body
LE: loop exit
PB: predicated region body
PF: predicated region fallthrough
CT: control target
= control target key end

     0   :  { %7 = vsyncpa [#allocation3], 0  ;;  %s769_s0 = inlined_call_operand.vmem [shape: bf16[256,48], index: 0, kind: input, shape index: {}]   ;;  %s770_s1 = inlined_call_operand.vmem [shape: bf16[48,128], index: 1, kind: input, shape index: {}]   ;;  %s771_s2 = inlined_call_operand.hbm [shape: bf16[256,128], index: 2, kind: output, shape index: {}]  }
   0x1   :  { %9 = vsyncpa [#allocation3 + $0x1], 0  ;;  %s664_s9 = smov 0   ;;  %s666_s10 = smov 0  }
   0x2   :  { %s668_s11 = smov 0   ;;  %s670_s12 = smov 0  }
   0x3 LB: > { %s685_s13 = sadd.s32 4294967295, %s645_s12   ;;  %s410_s14 = sadd.s32 4294967294, %s645_s12   ;;  %s645_s12 = sphi %s670_s12, %s777_s12   ;;  %s641_s11 = sphi %s668_s11, %s776_s11   ;;  %s637_s10 = sphi %s666_s10, %s775_s10   ;;  %s633_s9 = sphi %s664_s9, %s774_s9  }
   0x4   : > { %s689_s15 = sadd.s32 1, %s645_s12   ;;  %s69_s16 = sadd.s32 1, %s641_s11 }
   0x5   : > { %s66_s17 = ssub.s32 %s645_s12, %s689_s15  ;;  %p79_p0 = scmp.ne.s32.totalorder %s641_s11, %s637_s10 }
   0x6   : > { %p67_p1 = scmp.eq.s32.totalorder %s66_s17, 0  ;;  %p80_p2 = scmp.eq.s32.totalorder %s685_s13, 1 }
   0x7   : > { %p85_p3 = scmp.ne.s32.totalorder %s637_s10, %s633_s9  ;;  %p86_p4 = scmp.eq.s32.totalorder %s410_s14, 1 }
   0x8   : > { %s700_s18 = scalar_select %p67_p1, %s641_s11, %s69_s16  }
   0x9   : > { %p702_p5 = por %p80_p2, %p79_p0  ;;  %p706_p6 = por %p86_p4, %p85_p3 }
   0xa   : > { %p413_p7 = scmp.ge.s32.totalorder %s645_s12, 1  ;;  %p116_p8 = scmp.lt.s32.totalorder %s645_s12, 3 }
   0xc   : > { %p117_p9 = pnand %p413_p7, %p116_p8 }
   0xd   : > { %s415_s23 = sshll.u32 (!%p117_p9), %s685_s13, 4  ;;  %s135_s4 = sand.u32 (!%p117_p9), 1, %s637_s10  }
   0xe   : > { %120 = sbr.rel (%p117_p9) target bundleno = 195 (0xc3), region = 28  ;;  %p139_p10 = scmp.lt.s32.totalorder (!%p117_p9), %s415_s23, 31 }
   0xf   : > { %s414_s5 = sshll.u32 (!%p117_p9), %s135_s4, 6  ;;  %s485_s7 = sshll.u32 (!%p117_p9), %s685_s13, 6 }
  0x10   : > { %s137_s6 = scalar_lea.vmem (!%p117_p9), [#allocation2], %s414_s5  ;;  %s344_s16 = scalar_lea.hbm (!%p117_p9), %s771_s2, %s485_s7 }
  0x11   : > { %s345_s17 = sshll.u32 (!%p117_p9), %s137_s6, 4  ;;  %s347_s21 = sshll.u32 (!%p117_p9), %s344_s16, 4  ;;  %s346_s17 = int_to_ptr.vmem [resolvable:$true] %s345_s17  ;;  %s348_s21 = int_to_ptr.hbm [resolvable:$true] %s347_s21 }
  0x12   : > { %s333_s13 = scalar_lea.sflag (!%p117_p9), [#allocation3], %s135_s4  ;;  %s597_s22 = sshra.s32 (!%p117_p9), %s348_s21, 4  ;;  %s598_s22 = int_to_ptr.hbm [resolvable:$true] %s597_s22 }
  0x13   : > { %v484_v0 = vld [vmem:[%s770_s1 + $0x10] sm:$0xff]  ;;  %v483_v1 = vld [vmem:[%s770_s1 + $0x8] sm:$0xff]  ;;  %s779_s23 = smov (!%p139_p10, %s415_s23), 31  ;;  %v482_v2 = vld [vmem:[%s770_s1] sm:$0xff]  ;;  %vm226_vm0 = vcmask 392192   ;;  %p604_p0 = scmp.lt.s32.totalorder %s598_s22, %s771_s2 }
  0x14   : > { %256 = vmatpush.bf16.msra.mxu0 %v484_v0  ;;  %533 = vmatpush.bf16.msra.mxu1 %v484_v0  ;;  %s416_s26 = sshll.u32 %s779_s23, 2  ;;  %s599_s23 = scalar_lea.hbm %s598_s22, 64 }
  0x15   : > { %534 = vmatpush.bf16.msra.mxu2 %v484_v0  ;;  %535 = vmatpush.bf16.msra.mxu3 %v484_v0  ;;  %s142_s3 = scalar_lea.vmem %s769_s0, %s416_s26  ;;  %p600_p11 = scmp.ne.s32.totalorder %s598_s22, %s599_s23 }
  0x16   : > { %v474_v3 = vld [vmem:[%s142_s3] sm:$0xff]  ;;  %v476_v4 = vld [vmem:[%s142_s3 + $0x10] sm:$0xff]  ;;  %v475_v7 = vld [vmem:[%s142_s3 + $0x8] sm:$0xff]  ;;  %s603_s26 = scalar_lea.hbm %s771_s2, 128 }
  0x17   : > { %v478_v5 = vld [vmem:[%s142_s3 + $0x20] sm:$0xff]  ;;  %v480_v6 = vld [vmem:[%s142_s3 + $0x30] sm:$0xff]  ;;  %v477_v8 = vld [vmem:[%s142_s3 + $0x18] sm:$0xff]  ;;  %p601_p12 = pnand %p600_p11, %p702_p5  ;;  %p605_p1 = scmp.lt.s32.totalorder %s603_s26, %s599_s23 }
  0x18   : > { %257 = vmatpush.bf16.msra.mxu0 %v483_v1  ;;  %536 = vmatpush.bf16.msra.mxu1 %v483_v1  ;;  %v479_v9 = vld [vmem:[%s142_s3 + $0x28] sm:$0xff]  ;;  %v481_v10 = vld [vmem:[%s142_s3 + $0x38] sm:$0xff] }
  0x19   : > { %537 = vmatpush.bf16.msra.mxu2 %v483_v1  ;;  %538 = vmatpush.bf16.msra.mxu3 %v483_v1  ;;  %p602_p13 = pneg %p601_p12  ;;  %p606_p2 = por %p605_p1, %p604_p0 }
  0x1b   : > { %p607_p3 = pnand %p606_p2, %p602_p13 }
  0x1c   : > { %258 = vmatpush.bf16.msra.mxu0 %v482_v2  ;;  %539 = vmatpush.bf16.msra.mxu1 %v482_v2 }
  0x1d   : > { %540 = vmatpush.bf16.msra.mxu2 %v482_v2  ;;  %541 = vmatpush.bf16.msra.mxu3 %v482_v2 }
  0x1f   : > { %461 = vmatmul.msk.bf16.vlgmr.msra.gmra.mxu0 %vm226_vm0, %v474_v3  ;;  %463 = vmatmul.msk.bf16.vlgmr.msra.gmra.mxu1 %vm226_vm0, %v476_v4 }
  0x20   : > { %465 = vmatmul.msk.bf16.vlgmr.msra.gmra.mxu2 %vm226_vm0, %v478_v5  ;;  %467 = vmatmul.msk.bf16.vlgmr.msra.gmra.mxu3 %vm226_vm0, %v480_v6 }
  0x2f   : > { %462 = vmatmul.msk.bf16.gmra.mxu0 %vm226_vm0, %v475_v7  ;;  %464 = vmatmul.msk.bf16.gmra.mxu1 %vm226_vm0, %v477_v8 }
  0x30   : > { %466 = vmatmul.msk.bf16.gmra.mxu2 %vm226_vm0, %v479_v9  ;;  %468 = vmatmul.msk.bf16.gmra.mxu3 %vm226_vm0, %v481_v10 }
  0x9c   : > { %v260_v11 = vpop.f32.mrf.mxu0  ;;  %v270_v12 = vpop.f32.mrf.mxu1 }
  0xa3   : > { %v280_v13 = vpop.f32.mrf.mxu2  ;;  %v290_v14 = vpop.f32.mrf.mxu3 }
  0xa4   : > { %v262_v15 = vpop.f32.mrf.mxu0  ;;  %v272_v16 = vpop.f32.mrf.mxu1 }
  0xa5   : > { %v489_v17 = vpack.c.bf16 %v262_v15, %v260_v11  ;;  %v499_v18 = vpack.c.bf16 %v272_v16, %v270_v12 }
  0xa7   : > { %490 = vst [vmem:[%s137_s6] sm:$0xff] %v489_v17  }
  0xa8   : > { %527 = vst [vmem:[%s137_s6 + $0x10] sm:$0xff] %v499_v18  }
  0xab   : > { %v282_v19 = vpop.f32.mrf.mxu2  ;;  %v292_v20 = vpop.f32.mrf.mxu3 }
  0xac   : > { %v509_v21 = vpack.c.bf16 %v282_v19, %v280_v13  ;;  %v519_v22 = vpack.c.bf16 %v292_v20, %v290_v14  ;;  %v265_v23 = vpop.f32.mrf.mxu0  ;;  %v275_v24 = vpop.f32.mrf.mxu1 }
  0xae   : > { %529 = vst [vmem:[%s137_s6 + $0x20] sm:$0xff] %v509_v21  }
  0xaf   : > { %531 = vst [vmem:[%s137_s6 + $0x30] sm:$0xff] %v519_v22  }
  0xb3   : > { %v285_v25 = vpop.f32.mrf.mxu2  ;;  %v295_v26 = vpop.f32.mrf.mxu3 }
  0xb4   : > { %v267_v27 = vpop.f32.mrf.mxu0  ;;  %v277_v28 = vpop.f32.mrf.mxu1 }
  0xb5   : > { %v494_v29 = vpack.c.bf16 %v267_v27, %v265_v23  ;;  %v504_v30 = vpack.c.bf16 %v277_v28, %v275_v24 }
  0xb7   : > { %526 = vst [vmem:[%s137_s6 + $0x8] sm:$0xff] %v494_v29  }
  0xb8   : > { %528 = vst [vmem:[%s137_s6 + $0x18] sm:$0xff] %v504_v30  }
  0xbb   : > { %v287_v31 = vpop.f32.mrf.mxu2  ;;  %v297_v32 = vpop.f32.mrf.mxu3 }
  0xbc   : > { %v514_v33 = vpack.c.bf16 %v287_v31, %v285_v25  ;;  %v524_v34 = vpack.c.bf16 %v297_v32, %v295_v26 }
  0xbe   : > { %530 = vst [vmem:[%s137_s6 + $0x28] sm:$0xff] %v514_v33  }
  0xbf   : > { %532 = vst [vmem:[%s137_s6 + $0x38] sm:$0xff] %v524_v34  }
  0xc0   : > { %610 = shalt.err (!%p607_p3)
}
  0xc1   : > { %s647_s29 = smov 64   ;;  %s648_s30 = smov 4  }
  0xc2   : > { %542 = dma.vmem_to_hbm [thread:$0]  (%p702_p5), %s346_s17, 1024, %s348_s21, %s333_s13, %s647_s29, %s647_s29, %s648_s30  }
  0xc3 PF: > { %p548_p4 = scmp.ge.s32.totalorder %s645_s12, 2  ;;  %s362_s3 = sand.u32 1, %s633_s9  }
  0xc4   : > { %s363_s4 = scalar_lea.sflag [#allocation3], %s362_s3 }
  0xc5   : > { %p545_p7 = pnand %p548_p4, %p706_p6 }
  0xc7   : > { %p546_p8 = pneg %p545_p7 }
  0xc9   : > { %628 = dma.done.wait (%p546_p8), %s363_s4, 1024  }
  0xca   : > { %630 = vsyncadd (%p546_p8), %s363_s4, 4294966272  ;;  %p12_p9 = scmp.ge.s32.totalorder %s689_s15, 4   ;;  %s774_s9 = smov %s637_s10 }
  0xcb   : > { %s775_s10 = smov %s641_s11  ;;  %s776_s11 = smov %s700_s18 }
  0xcc   : > { %s777_s12 = smov %s689_s15  ;;  %14 = sbr.rel (!%p12_p9) target bundleno = 3 (0x3), region = 63 }
  0xd1   :  { %369 = vsyncpa [#allocation3], 1 }
  0xd2   :  { %371 = vsyncpa [#allocation3 + $0x1], 1 }

</bundles_post_ra>
